<compile_context>
chip_gen: v7x
topology: tpu7x:2x2x1
jax: 0.10.0
libtpu: 0.0.40
codegen_flags: <defaults>
</compile_context>

<pallas_src>
import functools
import math

import jax
import jax.numpy as jnp
from jax import lax
from jax.experimental import pallas as pl
from jax.experimental.pallas import tpu as pltpu


@functools.lru_cache(maxsize=None)
def _vmem_limit_bytes():
    cap = 128 * 1024 * 1024
    try:
        cap = int(pltpu.get_tpu_info().vmem_capacity_bytes)
    except Exception:
        pass
    # Half of physical VMEM, clamped to [32 MiB, 64 MiB]: 64 MiB on v5e/v6e
    # (128 MiB physical), 32 MiB on v7x (64 MiB physical).
    return int(max(32 * 1024 * 1024, min(cap // 2, 64 * 1024 * 1024)))


def _pick_tiles(n, *, min_parallel_blocks=2):
    """Pick (tm, tk): tm keeps >= min_parallel_blocks row blocks (v7x megacore),
    tk goes as large as divides n (MXU width / fewer grid steps)."""
    assert n % 128 == 0, "N must be a multiple of 128"
    tm = None
    for cand in (512, 384, 256, 128):
        if n % cand == 0 and n // cand >= min_parallel_blocks:
            tm = cand
            break
    if tm is None:
        tm = n  # tiny graph: single block
    tk = 128
    for cand in (512, 384, 256):
        if n % cand == 0:
            tk = cand
            break
    return tm, tk


# ---------------------------------------------------------------------------
# Kernel 1: support = x @ W1   (row-tiled, weight resident, in-kernel x cast)
# ---------------------------------------------------------------------------
def _support_kernel(x_ref, w_ref, o_ref):
    o_ref[...] = jnp.dot(
        x_ref[...].astype(w_ref.dtype), w_ref[...],
        preferred_element_type=jnp.float32).astype(o_ref.dtype)


def support_matmul(x, w, *, tm):
    n, f = x.shape
    f2, h = w.shape
    assert f == f2 and n % tm == 0
    flops = 2 * n * f * h
    bytes_accessed = int(n * f * 4 + f * h * 2 + n * h * 2)
    return pl.pallas_call(
        _support_kernel,
        out_shape=jax.ShapeDtypeStruct((n, h), jnp.bfloat16),
        grid_spec=pltpu.PrefetchScalarGridSpec(
            num_scalar_prefetch=0,
            grid=(n // tm,),
            in_specs=[
                pl.BlockSpec((tm, f), lambda i: (i, 0)),
                pl.BlockSpec((f, h), lambda i: (0, 0)),   # weight resident
            ],
            out_specs=pl.BlockSpec((tm, h), lambda i: (i, 0)),
        ),
        compiler_params=pltpu.CompilerParams(
            dimension_semantics=("parallel",),
            vmem_limit_bytes=_vmem_limit_bytes()),
        cost_estimate=pl.CostEstimate(flops=flops, transcendentals=0,
                                      bytes_accessed=bytes_accessed),
    )(x, w)


# ---------------------------------------------------------------------------
# Kernel 2: s2 = relu(adj @ s1 + b1) @ W2   (K-tiled aggregation, fused fc)
# ---------------------------------------------------------------------------
def _agg_relu_fc_kernel(adj_ref, s_ref, b_ref, w_ref, o_ref, acc_ref):
    @pl.when(pl.program_id(1) == 0)
    def _():
        acc_ref[...] = jnp.zeros_like(acc_ref)

    # adj tile cast to bf16 in-kernel (adj stays f32 in HBM, no wrapper pass).
    acc_ref[...] += jnp.dot(adj_ref[...].astype(s_ref.dtype), s_ref[...],
                            preferred_element_type=jnp.float32)

    @pl.when(pl.program_id(1) == pl.num_programs(1) - 1)
    def _():
        h = jnp.maximum(acc_ref[...] + b_ref[...], 0.0)
        # TODO(synk): training-mode dropout not emitted (inference identity).
        o_ref[...] = jnp.dot(h.astype(w_ref.dtype), w_ref[...],
                             preferred_element_type=jnp.float32
                             ).astype(o_ref.dtype)


def aggregate_relu_fc(adj, s, b, w, *, tm, tk):
    n = adj.shape[0]
    h = s.shape[1]
    h_out = w.shape[1]
    assert n % tm == 0 and n % tk == 0
    flops = 2 * n * n * h + 2 * n * h * h_out
    bytes_accessed = int(n * n * 4                       # adj (f32, read once)
                         + (n // tm) * n * h * 2         # s re-read per row block
                         + h * h_out * 2                 # W2 resident
                         + n * h_out * 2)                # output
    return pl.pallas_call(
        _agg_relu_fc_kernel,
        out_shape=jax.ShapeDtypeStruct((n, h_out), jnp.bfloat16),
        grid_spec=pltpu.PrefetchScalarGridSpec(
            num_scalar_prefetch=0,
            grid=(n // tm, n // tk),
            in_specs=[
                pl.BlockSpec((tm, tk), lambda i, k: (i, k)),       # adj rows (f32)
                pl.BlockSpec((tk, h), lambda i, k: (k, 0)),        # support (bf16)
                pl.BlockSpec((1, h), lambda i, k: (0, 0)),         # bias
                pl.BlockSpec((h, h_out), lambda i, k: (0, 0)),     # W2 resident
            ],
            out_specs=pl.BlockSpec((tm, h_out), lambda i, k: (i, 0)),
            scratch_shapes=[pltpu.VMEM((tm, h), jnp.float32)],
        ),
        compiler_params=pltpu.CompilerParams(
            dimension_semantics=("parallel", "arbitrary"),
            vmem_limit_bytes=_vmem_limit_bytes()),
        cost_estimate=pl.CostEstimate(flops=flops, transcendentals=0,
                                      bytes_accessed=bytes_accessed),
    )(adj, s, b, w)


# ---------------------------------------------------------------------------
# Kernel 3: x_out = adj @ s2 + b2 ; xn = normalize(x_out) (fused, two outputs)
#           accumulates directly into the resident f32 output block.
# ---------------------------------------------------------------------------
def _agg_bias_norm_kernel(adj_ref, s_ref, b_ref, o_ref, xn_ref):
    k = pl.program_id(1)
    part = jnp.dot(adj_ref[...].astype(s_ref.dtype), s_ref[...],
                   preferred_element_type=jnp.float32)

    @pl.when(k == 0)
    def _():
        o_ref[...] = part

    @pl.when(k > 0)
    def _():
        o_ref[...] += part

    @pl.when(k == pl.num_programs(1) - 1)
    def _():
        xo = o_ref[...] + b_ref[...]
        o_ref[...] = xo
        norm = jnp.maximum(
            jnp.sqrt(jnp.sum(xo * xo, axis=-1, keepdims=True)),
            jnp.float32(1e-12))                    # matches torch F.normalize eps
        xn_ref[...] = (xo / norm).astype(xn_ref.dtype)


def aggregate_bias_norm(adj, s, b, *, tm, tk):
    n = adj.shape[0]
    h = s.shape[1]
    assert n % tm == 0 and n % tk == 0
    flops = 2 * n * n * h
    bytes_accessed = int(n * n * 4                       # adj (f32)
                         + (n // tm) * n * h * 2         # s re-read per row block
                         + n * h * 4                     # x_out (f32)
                         + n * h * 2)                    # xn (bf16)
    return pl.pallas_call(
        _agg_bias_norm_kernel,
        out_shape=(jax.ShapeDtypeStruct((n, h), jnp.float32),
                   jax.ShapeDtypeStruct((n, h), jnp.bfloat16)),
        grid_spec=pltpu.PrefetchScalarGridSpec(
            num_scalar_prefetch=0,
            grid=(n // tm, n // tk),
            in_specs=[
                pl.BlockSpec((tm, tk), lambda i, k: (i, k)),
                pl.BlockSpec((tk, h), lambda i, k: (k, 0)),
                pl.BlockSpec((1, h), lambda i, k: (0, 0)),
            ],
            out_specs=[pl.BlockSpec((tm, h), lambda i, k: (i, 0)),
                       pl.BlockSpec((tm, h), lambda i, k: (i, 0))],
        ),
        compiler_params=pltpu.CompilerParams(
            dimension_semantics=("parallel", "arbitrary"),
            vmem_limit_bytes=_vmem_limit_bytes()),
        cost_estimate=pl.CostEstimate(flops=flops, transcendentals=0,
                                      bytes_accessed=bytes_accessed),
    )(adj, s, b)


# ---------------------------------------------------------------------------
# Kernel 4: x_dis = xn @ xn.T   (xn already normalized & bf16; NT contraction)
# ---------------------------------------------------------------------------
def _feature_dis_kernel(xi_ref, xj_ref, o_ref):
    o_ref[...] = lax.dot_general(
        xi_ref[...], xj_ref[...],
        dimension_numbers=(((1,), (1,)), ((), ())),     # (tm,h) x (tn,h) -> (tm,tn)
        preferred_element_type=jnp.float32).astype(o_ref.dtype)


def feature_dis(xn, *, tm, tn):
    n, h = xn.shape
    assert n % tm == 0 and n % tn == 0
    flops = 2 * n * n * h
    bytes_accessed = int((n // tn) * n * h * 2           # xi re-read per col block
                         + (n // tm) * n * h * 2         # xj re-read per row block
                         + n * n * 4)                    # output
    return pl.pallas_call(
        _feature_dis_kernel,
        # Keep f32 output for torch-semantics parity; switch to bf16 if the
        # downstream loss tolerates it (halves the N^2 HBM writeback).
        out_shape=jax.ShapeDtypeStruct((n, n), jnp.float32),
        grid_spec=pltpu.PrefetchScalarGridSpec(
            num_scalar_prefetch=0,
            grid=(n // tm, n // tn),
            in_specs=[
                pl.BlockSpec((tm, h), lambda i, j: (i, 0)),
                pl.BlockSpec((tn, h), lambda i, j: (j, 0)),
            ],
            out_specs=pl.BlockSpec((tm, tn), lambda i, j: (i, j)),
        ),
        compiler_params=pltpu.CompilerParams(
            dimension_semantics=("parallel", "parallel"),
            vmem_limit_bytes=_vmem_limit_bytes()),
        cost_estimate=pl.CostEstimate(flops=flops, transcendentals=0,
                                      bytes_accessed=bytes_accessed),
    )(xn, xn)


# ---------------------------------------------------------------------------
# Full GCN forward
# ---------------------------------------------------------------------------
def gcn_forward(x, adj, w1, b1, w2, b2, *, tm=None, tk=None, tn=None):
    """x: [N, nfeat] f32, adj: [N, N] f32 (dense, normalized); weights [in, out]."""
    n = adj.shape[0]
    auto_tm, auto_tk = _pick_tiles(n)
    tm = auto_tm if tm is None else tm
    tk = auto_tk if tk is None else tk
    tn = auto_tk if tn is None else tn

    bf = jnp.bfloat16
    # Only the tiny weight matrices are pre-cast; adj / x stay f32 in HBM and
    # are cast per-tile inside the kernels (no extra full HBM pass over N x N).
    w1_bf, w2_bf = w1.astype(bf), w2.astype(bf)

    s1 = support_matmul(x, w1_bf, tm=tm)                             # x @ W1
    s2 = aggregate_relu_fc(adj, s1, b1, w2_bf, tm=tm, tk=tk)         # relu(adj@s1+b1)@W2
    x_out, xn = aggregate_bias_norm(adj, s2, b2, tm=tm, tk=tk)       # adj@s2+b2, normalize
    x_dis = feature_dis(xn, tm=tm, tn=tn)                            # cosine-sim matrix
    return x_out, x_dis


# ---------------------------------------------------------------------------
# References
# ---------------------------------------------------------------------------
def mirror_reference(x, adj, w1, b1, w2, b2):
    """Pure-JAX reference mirroring the kernel's bf16-operand / f32-accum policy."""
    bf = jnp.bfloat16
    x_bf, adj_bf = x.astype(bf), adj.astype(bf)
    w1_bf, w2_bf = w1.astype(bf), w2.astype(bf)
    s1 = jnp.dot(x_bf, w1_bf, preferred_element_type=jnp.float32).astype(bf)
    h1 = jnp.maximum(
        jnp.dot(adj_bf, s1, preferred_element_type=jnp.float32) + b1, 0.0)
    s2 = jnp.dot(h1.astype(bf), w2_bf,
                 preferred_element_type=jnp.float32).astype(bf)
    x_out = jnp.dot(adj_bf, s2, preferred_element_type=jnp.float32) + b2
    xn = x_out / jnp.maximum(
        jnp.sqrt(jnp.sum(x_out * x_out, axis=1, keepdims=True)), 1e-12)
    xn_bf = xn.astype(bf)
    x_dis = jnp.dot(xn_bf, xn_bf.T, preferred_element_type=jnp.float32)
    return x_out, x_dis


def f32_reference(x, adj, w1, b1, w2, b2):
    """Full-f32 reference matching the PyTorch module semantics (eval mode)."""
    h1 = jnp.maximum(adj @ (x @ w1) + b1, 0.0)
    x_out = adj @ (h1 @ w2) + b2
    xn = x_out / jnp.maximum(
        jnp.sqrt(jnp.sum(x_out * x_out, axis=1, keepdims=True)), 1e-12)
    return x_out, xn @ xn.T


def init_gcn_params(key, nfeat, nhid):
    """Matches GraphConvolutionLayer.reset_parameters (uniform +-1/sqrt(out))."""
    k1, k2, k3, k4 = jax.random.split(key, 4)
    stdv = 1.0 / math.sqrt(nhid)
    w1 = jax.random.uniform(k1, (nfeat, nhid), jnp.float32, -stdv, stdv)
    b1 = jax.random.uniform(k2, (1, nhid), jnp.float32, -stdv, stdv)
    w2 = jax.random.uniform(k3, (nhid, nhid), jnp.float32, -stdv, stdv)
    b2 = jax.random.uniform(k4, (1, nhid), jnp.float32, -stdv, stdv)
    return w1, b1, w2, b2


if __name__ == "__main__":
    # Small but 128-aligned shapes (auto tiles: tm=128 -> 2 parallel row blocks
    # for v7x's two TensorCores, tk=tn=256 -> full MXU width on v6e/v7x).
    N, NFEAT, NHID = 256, 128, 128

    key = jax.random.PRNGKey(0)
    kx, ka, kp = jax.random.split(key, 3)

    x = jax.random.normal(kx, (N, NFEAT), jnp.float32)

    # Deterministic sparse-ish symmetric adjacency with self loops, row-normalized
    # (dense stand-in for torch.spmm's sparse adj).
    a = jax.random.uniform(ka, (N, N), jnp.float32)
    adj = jnp.where(a < 0.1, a, 0.0)
    adj = adj + adj.T + jnp.eye(N, dtype=jnp.float32)
    adj = adj / jnp.sum(adj, axis=1, keepdims=True)

    w1, b1, w2, b2 = init_gcn_params(kp, NFEAT, NHID)

    x_out, x_dis = gcn_forward(x, adj, w1, b1, w2, b2)
    jax.block_until_ready((x_out, x_dis))

    # Strict check vs. a reference with identical dtype policy.
    x_ref_m, dis_ref_m = mirror_reference(x, adj, w1, b1, w2, b2)
    assert jnp.allclose(x_out, x_ref_m, atol=5e-3, rtol=5e-3), "x mismatch (mirror)"
    assert jnp.allclose(x_dis, dis_ref_m, atol=5e-3, rtol=5e-3), "x_dis mismatch (mirror)"

    # Loose sanity check vs. full-f32 torch-semantics reference.
    x_ref, dis_ref = f32_reference(x, adj, w1, b1, w2, b2)
    assert jnp.allclose(x_out, x_ref, atol=1e-1, rtol=1e-1), "x mismatch (f32 ref)"
    assert jnp.allclose(x_dis, dis_ref, atol=1e-1, rtol=1e-1), "x_dis mismatch (f32 ref)"

    print("KERNEL_OK")
</pallas_src>

<mosaic_0001>
module attributes {stable_mosaic.version = 11 : i64} {
  func.func @_support_kernel(%arg0: i32, %arg1: memref<128x128xf32, #tpu.memory_space<vmem>>, %arg2: memref<128x128xbf16, #tpu.memory_space<vmem>>, %arg3: memref<128x128xbf16, #tpu.memory_space<vmem>>) attributes {dimension_semantics = [#tpu.dimension_semantics<parallel>], iteration_bounds = array<i64: 2>, scalar_prefetch = 0 : i64, scratch_operands = 0 : i64, tpu.core_type = #tpu.core_type<tc>, window_params = [{transform_indices = @transform_0, window_bounds = array<i64: 128, 128>}, {pipeline_mode = #tpu.pipeline_mode<synchronous>, transform_indices = @transform_1, window_bounds = array<i64: 128, 128>}, {transform_indices = @transform_2, window_bounds = array<i64: 128, 128>}]} {
    %c0 = arith.constant 0 : index
    %c0_0 = arith.constant 0 : index
    %0 = vector.load %arg1[%c0, %c0_0] : memref<128x128xf32, #tpu.memory_space<vmem>>, vector<128x128xf32>
    %1 = arith.truncf %0 : vector<128x128xf32> to vector<128x128xbf16>
    %c0_1 = arith.constant 0 : index
    %c0_2 = arith.constant 0 : index
    %2 = vector.load %arg2[%c0_1, %c0_2] : memref<128x128xbf16, #tpu.memory_space<vmem>>, vector<128x128xbf16>
    %cst = arith.constant dense<0.000000e+00> : vector<128x128xf32>
    %3 = tpu.matmul %1, %2, %cst {dimension_numbers = #tpu.dot_dimension_numbers<[1], [0], [0], [1], [0, 0, 1, 1], [], []>} : vector<128x128xbf16>, vector<128x128xbf16>, vector<128x128xf32> -> vector<128x128xf32>
    %4 = arith.truncf %3 : vector<128x128xf32> to vector<128x128xbf16>
    %c0_3 = arith.constant 0 : index
    %c0_4 = arith.constant 0 : index
    %5 = vector.load %arg3[%c0_3, %c0_4] : memref<128x128xbf16, #tpu.memory_space<vmem>>, vector<128x128xbf16>
    tpu.vector_store %arg3[%c0_3, %c0_4], %4 {strides = array<i32>} : memref<128x128xbf16, #tpu.memory_space<vmem>>, vector<128x128xbf16>,
    return
  }
  func.func @transform_0(%arg0: i32) -> (i32, i32) {
    %c0_i32 = arith.constant 0 : i32
    %c0_i32_0 = arith.constant 0 : i32
    return %arg0, %c0_i32 : i32, i32
  }
  func.func @transform_1(%arg0: i32) -> (i32, i32) {
    %c0_i32 = arith.constant 0 : i32
    %c0_i32_0 = arith.constant 0 : i32
    %c0_i32_1 = arith.constant 0 : i32
    return %c0_i32, %c0_i32_0 : i32, i32
  }
  func.func @transform_2(%arg0: i32) -> (i32, i32) {
    %c0_i32 = arith.constant 0 : i32
    %c0_i32_0 = arith.constant 0 : i32
    return %arg0, %c0_i32 : i32, i32
  }
}

</mosaic_0001>

<bundles_post_ra>
// kernel: tpu_custom_call.1
= control target key start
LH: loop header
LB: loop body
LE: loop exit
PB: predicated region body
PF: predicated region fallthrough
CT: control target
= control target key end

     0   :  { %7 = vsyncpa [#allocation3], 0  ;;  %s1156_s0 = inlined_call_operand.hbm [shape: f32[256,128], index: 0, kind: input, shape index: {}]   ;;  %s1157_s1 = inlined_call_operand.hbm [shape: bf16[128,128], index: 1, kind: input, shape index: {}]   ;;  %s1158_s2 = inlined_call_operand.hbm [shape: bf16[256,128], index: 2, kind: output, shape index: {}]  }
   0x1   :  { %9 = vsyncpa [#allocation3 + $0x1], 0 }
   0x2   :  { %10 = vsyncpa [#allocation6], 0 }
   0x3   :  { %11 = vsyncpa [#allocation4], 0 }
   0x4   :  { %13 = vsyncpa [#allocation4 + $0x1], 0  ;;  %s936_s9 = smov 0   ;;  %s938_s10 = smov 0  }
   0x5   :  { %s940_s11 = smov 0   ;;  %s942_s12 = smov 0  }
   0x6 LB: > { %s957_s13 = sadd.s32 4294967295, %s910_s12   ;;  %s542_s14 = sadd.s32 4294967294, %s910_s12   ;;  %s910_s12 = sphi %s942_s12, %s1178_s12   ;;  %s906_s11 = sphi %s940_s11, %s1177_s11   ;;  %s902_s10 = sphi %s938_s10, %s1176_s10   ;;  %s898_s9 = sphi %s936_s9, %s1175_s9  }
   0x7   : > { %p39_p0 = scmp.ne.s32.totalorder %s902_s10, %s898_s9  ;;  %p1159_p1 = scmp.eq.s32.totalorder %s957_s13, 0 }
   0x8   : > { %p90_p3 = scmp.eq.s32.totalorder %s542_s14, 1  ;;  %p543_p5 = scmp.ge.s32.totalorder %s910_s12, 1 }
   0x9   : > { %p966_p4 = por %p1159_p1, %p39_p0  ;;  %p97_p7 = scmp.lt.s32.totalorder %s910_s12, 3 }
   0xa   : > { %p971_p6 = por %p90_p3, %p39_p0  ;;  %s912_s18 = smov [#allocation5]  }
   0xb   : > { %s1162_s15 = scalar_select %p966_p4, 1, 0 }
   0xc   : > { %s1163_s16 = scalar_select %p971_p6, 1, 0 }
   0xd   : > { %p976_p8 = pnand %p543_p5, %p97_p7  ;;  %s109_s19 = sshll.u32 %s912_s18, 4  ;;  %s980_s19 = int_to_ptr.vmem [resolvable:$true] %s109_s19 }
   0xe   : > { %s992_s21 = sadd.s32 1, %s910_s12   ;;  %s26_s22 = sadd.s32 1, %s906_s11 }
   0xf   : > { %s1164_s17 = scalar_select %p976_p8, 1, 0 }
  0x10   : > { %p719_p9 = pneg %p976_p8  ;;  %s23_s23 = ssub.s32 %s910_s12, %s992_s21 }
  0x11   : > { %s782_s26 = scalar_lea.hbm %s1157_s1, 1024 }
  0x12   : > { %p987_p11 = pnand %p719_p9, %p1159_p1  ;;  %p783_p12 = scmp.ne.s32.totalorder %s1157_s1, %s782_s26 }
  0x13   : > { %p789_p5 = scmp.lt.u32.totalorder %s782_s26, %s1157_s1 }
  0x14   : > { %p784_p13 = pneg %p987_p11 }
  0x16   : > { %p785_p0 = pnand %p784_p13, %p783_p12 }
  0x18   : > { %p786_p3 = pneg %p785_p0 }
  0x1a   : > { %p791_p7 = pnand %p789_p5, %p786_p3 }
  0x1c   : > { %794 = shalt.err (!%p791_p7)
}
  0x1d   : > { %s795_s3 = scalar_lea.vmem %s980_s19, 1024  ;;  %p803_p2 = scmp.lt.s32.totalorder %s980_s19, %s980_s19 }
  0x1e   : > { %p796_p9 = scmp.ne.s32.totalorder %s980_s19, %s795_s3  ;;  %p804_p6 = scmp.lt.s32.totalorder %s795_s3, %s795_s3 }
  0x20   : > { %p798_p10 = pnand %p796_p9, %p784_p13  ;;  %p805_p4 = por %p804_p6, %p803_p2 }
  0x22   : > { %p799_p1 = pneg %p798_p10 }
  0x24   : > { %p806_p8 = pnand %p805_p4, %p799_p1 }
  0x26   : > { %809 = shalt.err (!%p806_p8)
}
  0x27   : > { %s913_s4 = smov 64   ;;  %s914_s5 = smov 4  }
  0x28   : > { %722 = dma.hbm_to_vmem [thread:$0]  (!%p987_p11), %s1157_s1, 1024, %s980_s19, [#allocation6], %s913_s4, %s913_s4, %s914_s5  }
  0x29   : > { %p24_p2 = scmp.eq.s32.totalorder %s23_s23, 0  ;;  %p33_p1 = scmp.ne.s32.totalorder %s906_s11, %s902_s10 }
  0x2a   : > { %p34_p4 = scmp.eq.s32.totalorder %s910_s12, 0  ;;  %p732_p6 = scmp.lt.s32.totalorder %s910_s12, 2 }
  0x2b   : > { %s1023_s8 = scalar_select %p24_p2, %s906_s11, %s26_s22  }
  0x2c   : > { %p35_p8 = por %p34_p4, %p33_p1  ;;  %p1166_p10 = scmp.eq.s32.totalorder %s957_s13, 1 }
  0x2d   : > { %s123_s18 = sand.u32 1, %s906_s11   ;;  %s582_s24 = sshll.u32 %s910_s12, 11 }
  0x2e   : > { %p1027_p12 = por %p1166_p10, %p33_p1  ;;  %s546_s25 = sshll.u32 %s123_s18, 7 }
  0x2f   : > { %s1036_s27 = scalar_lea.hbm %s1156_s0, %s582_s24  ;;  %s127_s19 = scalar_lea.vmem [#allocation2], %s546_s25 }
  0x30   : > { %s134_s22 = sshll.u32 %s127_s19, 4  ;;  %p1038_p11 = pnand %p732_p6, %p35_p8  ;;  %s1042_s22 = int_to_ptr.vmem [resolvable:$true] %s134_s22 }
  0x31   : > { %s1044_s28 = scalar_lea.sflag [#allocation3], %s123_s18  ;;  %s810_s29 = scalar_lea.hbm %s1036_s27, 2048 }
  0x32   : > { %p811_p13 = scmp.ne.s32.totalorder %s1036_s27, %s810_s29  ;;  %p812_p0 = pneg %p1038_p11 }
  0x33   : > { %s815_s4 = scalar_lea.hbm %s1156_s0, 4096  ;;  %p816_p7 = scmp.lt.u32.totalorder %s1036_s27, %s1156_s0 }
  0x34   : > { %p813_p3 = pnand %p812_p0, %p811_p13  ;;  %p817_p9 = scmp.lt.u32.totalorder %s815_s4, %s810_s29 }
  0x35   : > { %p819_p1 = scmp.lt.u32.totalorder %s810_s29, %s1036_s27 }
  0x36   : > { %p814_p5 = pneg %p813_p3  ;;  %p818_p2 = por %p817_p9, %p816_p7 }
  0x38   : > { %p820_p4 = por %p819_p1, %p818_p2 }
  0x3a   : > { %p821_p6 = pnand %p820_p4, %p814_p5 }
  0x3c   : > { %824 = shalt.err (!%p821_p6)
}
  0x3d   : > { %s825_s7 = scalar_lea.vmem %s1042_s22, 2048  ;;  %s915_s18 = smov [#allocation2]  }
  0x3e   : > { %p826_p8 = scmp.ne.s32.totalorder %s1042_s22, %s825_s7  ;;  %s830_s24 = sshll.u32 %s915_s18, 4  ;;  %s831_s24 = int_to_ptr.vmem [resolvable:$false] %s830_s24 }
  0x3f   : > { %s832_s25 = scalar_lea.vmem %s831_s24, 4096  ;;  %p833_p3 = scmp.lt.s32.totalorder %s1042_s22, %s831_s24 }
  0x40   : > { %p828_p10 = pnand %p826_p8, %p812_p0  ;;  %p834_p7 = scmp.lt.s32.totalorder %s832_s25, %s825_s7 }
  0x42   : > { %p829_p13 = pneg %p828_p10  ;;  %p835_p9 = por %p834_p7, %p833_p3 }
  0x44   : > { %p836_p2 = pnand %p835_p9, %p829_p13 }
  0x46   : > { %839 = shalt.err (!%p836_p2)
}
  0x47   : > { %s916_s20 = smov 128   ;;  %s917_s26 = smov 8  }
  0x48   : > { %726 = dma.hbm_to_vmem [thread:$0]  (!%p1038_p11), %s1036_s27, 2048, %s1042_s22, %s1044_s28, %s916_s20, %s916_s20, %s917_s26  }
  0x49   : > { %p1169_p0 = scmp.ne.s32.totalorder %s1164_s17, 0 }
  0x4a   : > { %s1075_s19 = sand.u32 (!%p1169_p0), 1, %s902_s10   ;;  %p1170_p5 = scmp.ne.s32.totalorder (!%p1169_p0), %s1162_s15, 0 }
  0x4b   : > { %146 = sbr.rel (%p1169_p0) target bundleno = 359 (0x167), region = 28  ;;  %s550_s29 = sshll.u32 (!%p1169_p0), %s1075_s19, 7 }
  0x4c   : > { %s149_s30 = scalar_lea.sflag (!%p1169_p0), [#allocation3], %s1075_s19  ;;  %s1079_s3 = scalar_lea.vmem (!%p1169_p0), [#allocation2], %s550_s29 }
  0x52   : > { %885 = dma.done.wait (%p1170_p5), %s149_s30, 2048  }
  0x53   : > { %887 = vsyncadd (%p1170_p5), %s149_s30, 4294965248  ;;  %p1171_p11 = scmp.eq.s32.totalorder %s957_s13, 0 }
  0x55   : > { %889 = dma.done.wait (%p1171_p11), [#allocation6], 1024   ;;  %p1172_p1 = pmov %p1171_p11 }
  0x56   : > { %v774_v0 = vld [vmem:[#allocation5] sm:$0xff]   ;;  %v775_v1 = vld [vmem:[#allocation5 + $0x8] sm:$0xff]   ;;  %v776_v2 = vld [vmem:[#allocation5 + $0x10] sm:$0xff]   ;;  %s552_s15 = sshll.u32 %s1075_s19, 6  ;;  %s599_s22 = sshll.u32 %s957_s13, 10 }
  0x57   : > { %891 = vsyncadd (%p1172_p1), [#allocation6], 4294966272  ;;  %663 = vmatprep.subr.bf16.mxu0 %v774_v0  ;;  %695 = vmatprep.subr.bf16.mxu1 %v774_v0  ;;  %v777_v3 = vld [vmem:[#allocation5 + $0x18] sm:$0xff]   ;;  %v180_v4 = vld [vmem:[%s1079_s3] sm:$0xff]  ;;  %s176_s17 = scalar_lea.vmem [#allocation7], %s552_s15  ;;  %s1112_s4 = scalar_lea.hbm %s1158_s2, %s599_s22 }
  0x58   : > { %664 = vmatpush3.bf16.msra.mxu0 %v774_v0  ;;  %703 = vmatpush3.bf16.msra.mxu1 %v774_v0  ;;  %v181_v5 = vld [vmem:[%s1079_s3 + $0x8] sm:$0xff]  ;;  %v188_v6 = vld [vmem:[%s1079_s3 + $0x40] sm:$0xff]  ;;  %v780_v12 = vld [vmem:[#allocation5 + $0x30] sm:$0xff]   ;;  %s459_s27 = sshll.u32 %s176_s17, 4  ;;  %s446_s13 = scalar_lea.sflag [#allocation4], %s1075_s19  ;;  %s1107_s27 = int_to_ptr.vmem [resolvable:$true] %s459_s27 }
  0x59   : > { %665 = vmatprep.subr.bf16.mxu0 %v775_v1  ;;  %696 = vmatprep.subr.bf16.mxu1 %v775_v1  ;;  %v196_v7 = vpack.c.bf16 %v181_v5, %v180_v4  ;;  %v189_v8 = vld [vmem:[%s1079_s3 + $0x48] sm:$0xff]  ;;  %v778_v10 = vld [vmem:[#allocation5 + $0x20] sm:$0xff]   ;;  %v781_v13 = vld [vmem:[#allocation5 + $0x38] sm:$0xff]   ;;  %s840_s5 = scalar_lea.vmem %s1107_s27, 1024  ;;  %s918_s6 = smov [#allocation7]  }
  0x5a   : > { %v200_v9 = vpack.c.bf16 %v189_v8, %v188_v6  ;;  %v779_v11 = vld [vmem:[#allocation5 + $0x28] sm:$0xff]   ;;  %v182_v14 = vld [vmem:[%s1079_s3 + $0x10] sm:$0xff]  ;;  %v183_v15 = vld [vmem:[%s1079_s3 + $0x18] sm:$0xff]  ;;  %p841_p4 = scmp.ne.s32.totalorder %s1107_s27, %s840_s5  ;;  %s844_s7 = sshll.u32 %s918_s6, 4  ;;  %s845_s7 = int_to_ptr.vmem [resolvable:$false] %s844_s7 }
  0x5b   : > { %679 = vmatprep.mubr.bf16.mxu0 %v196_v7  ;;  %v190_v16 = vld [vmem:[%s1079_s3 + $0x50] sm:$0xff]  ;;  %v191_v17 = vld [vmem:[%s1079_s3 + $0x58] sm:$0xff]  ;;  %v184_v18 = vld [vmem:[%s1079_s3 + $0x20] sm:$0xff]  ;;  %v197_v22 = vpack.c.bf16 %v183_v15, %v182_v14  ;;  %s846_s18 = scalar_lea.vmem %s845_s7, 2048  ;;  %p847_p10 = scmp.lt.s32.totalorder %s1107_s27, %s845_s7 }
  0x5c   : > { %666 = vmatpush3.bf16.msra.mxu0 %v775_v1  ;;  %704 = vmatpush3.bf16.msra.mxu1 %v775_v1  ;;  %v185_v19 = vld [vmem:[%s1079_s3 + $0x28] sm:$0xff]  ;;  %v192_v20 = vld [vmem:[%s1079_s3 + $0x60] sm:$0xff]  ;;  %v201_v23 = vpack.c.bf16 %v191_v17, %v190_v16  ;;  %v186_v26 = vld [vmem:[%s1079_s3 + $0x30] sm:$0xff]  ;;  %p842_p6 = pnand %p841_p4, %p1027_p12  ;;  %p848_p13 = scmp.lt.s32.totalorder %s846_s18, %s840_s5 }
  0x5d   : > { %667 = vmatprep.subr.bf16.mxu0 %v776_v2  ;;  %697 = vmatprep.subr.bf16.mxu1 %v776_v2  ;;  %v193_v21 = vld [vmem:[%s1079_s3 + $0x68] sm:$0xff]  ;;  %v198_v24 = vpack.c.bf16 %v185_v19, %v184_v18  ;;  %v187_v27 = vld [vmem:[%s1079_s3 + $0x38] sm:$0xff]  ;;  %v194_v28 = vld [vmem:[%s1079_s3 + $0x70] sm:$0xff] }
  0x5e   : > { %687 = vmatprep.mubr.bf16.mxu1 %v200_v9  ;;  %v202_v25 = vpack.c.bf16 %v193_v21, %v192_v20  ;;  %v195_v29 = vld [vmem:[%s1079_s3 + $0x78] sm:$0xff]  ;;  %v199_v30 = vpack.c.bf16 %v187_v27, %v186_v26  ;;  %p843_p8 = pneg %p842_p6  ;;  %p849_p3 = por %p848_p13, %p847_p10 }
  0x5f   : > { %v203_v31 = vpack.c.bf16 %v195_v29, %v194_v28 }
  0x60   : > { %668 = vmatpush3.bf16.msra.mxu0 %v776_v2  ;;  %705 = vmatpush3.bf16.msra.mxu1 %v776_v2  ;;  %p850_p7 = pnand %p849_p3, %p843_p8 }
  0x61   : > { %669 = vmatprep.subr.bf16.mxu0 %v777_v3  ;;  %698 = vmatprep.subr.bf16.mxu1 %v777_v3 }
  0x64   : > { %670 = vmatpush3.bf16.msra.mxu0 %v777_v3  ;;  %706 = vmatpush3.bf16.msra.mxu1 %v777_v3 }
  0x65   : > { %671 = vmatprep.subr.bf16.mxu0 %v778_v10  ;;  %699 = vmatprep.subr.bf16.mxu1 %v778_v10 }
  0x68   : > { %672 = vmatpush3.bf16.msra.mxu0 %v778_v10  ;;  %707 = vmatpush3.bf16.msra.mxu1 %v778_v10 }
  0x69   : > { %673 = vmatprep.subr.bf16.mxu0 %v779_v11  ;;  %700 = vmatprep.subr.bf16.mxu1 %v779_v11 }
  0x6c   : > { %674 = vmatpush3.bf16.msra.mxu0 %v779_v11  ;;  %708 = vmatpush3.bf16.msra.mxu1 %v779_v11 }
  0x6d   : > { %675 = vmatprep.subr.bf16.mxu0 %v780_v12  ;;  %701 = vmatprep.subr.bf16.mxu1 %v780_v12 }
  0x70   : > { %676 = vmatpush3.bf16.msra.mxu0 %v780_v12  ;;  %709 = vmatpush3.bf16.msra.mxu1 %v780_v12 }
  0x71   : > { %677 = vmatprep.subr.bf16.mxu0 %v781_v13  ;;  %702 = vmatprep.subr.bf16.mxu1 %v781_v13 }
  0x74   : > { %678 = vmatpush3.bf16.msra.mxu0 %v781_v13  ;;  %710 = vmatpush3.bf16.msra.mxu1 %v781_v13 }
  0x77   : > { %680 = vmatmul.mubr.bf16.vlgmr.msra.gmra.mrb[0].mxu0 %v197_v22  ;;  %688 = vmatmul.mubr.bf16.vlgmr.msra.gmra.mrb[0].mxu1 %v201_v23 }
  0x78   : > { %683 = vmatprep.mubr.bf16.mxu0 %v198_v24  ;;  %691 = vmatprep.mubr.bf16.mxu1 %v202_v25 }
  0x7f   : > { %684 = vmatmul.mubr.bf16.gmra.mrb[4].mxu0 %v199_v30  ;;  %692 = vmatmul.mubr.bf16.gmra.mrb[4].mxu1 %v203_v31 }
 0x14a   : > { %v681_v32 = vpop.f32.mrb[0].mxu0  ;;  %v689_v33 = vpop.f32.mrb[0].mxu1 }
 0x14b   : > { %v302_v34 = vpop.f32.mrb[1].mxu0  ;;  %v334_v35 = vpop.f32.mrb[1].mxu1 }
 0x14c   : > { %v682_v36 = vpop.f32.mrb[2].mxu0  ;;  %v690_v37 = vpop.f32.mrb[2].mxu1 }
 0x14d   : > { %v608_v38 = vpack.c.bf16 %v682_v36, %v681_v32  ;;  %v628_v39 = vpack.c.bf16 %v690_v37, %v689_v33  ;;  %v305_v40 = vpop.f32.mrb[3].mxu0  ;;  %v337_v41 = vpop.f32.mrb[3].mxu1 }
 0x14e   : > { %v603_v42 = vpack.c.bf16 %v305_v40, %v302_v34  ;;  %v623_v43 = vpack.c.bf16 %v337_v41, %v334_v35 }
 0x14f   : > { %640 = vst [vmem:[%s176_s17 + $0x8] sm:$0xff] %v608_v38   ;;  %644 = vst [vmem:[%s176_s17 + $0x28] sm:$0xff] %v628_v39  }
 0x150   : > { %604 = vst [vmem:[%s176_s17] sm:$0xff] %v603_v42   ;;  %643 = vst [vmem:[%s176_s17 + $0x20] sm:$0xff] %v623_v43  }
 0x152   : > { %v685_v44 = vpop.f32.mrb[4].mxu0  ;;  %v693_v45 = vpop.f32.mrb[4].mxu1 }
 0x153   : > { %v318_v46 = vpop.f32.mrb[5].mxu0  ;;  %v350_v47 = vpop.f32.mrb[5].mxu1 }
 0x154   : > { %v686_v48 = vpop.f32.mrb[6].mxu0  ;;  %v694_v49 = vpop.f32.mrb[6].mxu1 }
 0x155   : > { %v618_v50 = vpack.c.bf16 %v686_v48, %v685_v44  ;;  %v638_v51 = vpack.c.bf16 %v694_v49, %v693_v45  ;;  %v321_v52 = vpop.f32.mrb[7].mxu0  ;;  %v353_v53 = vpop.f32.mrb[7].mxu1 }
 0x156   : > { %v613_v54 = vpack.c.bf16 %v321_v52, %v318_v46  ;;  %v633_v55 = vpack.c.bf16 %v353_v53, %v350_v47 }
 0x157   : > { %642 = vst [vmem:[%s176_s17 + $0x18] sm:$0xff] %v618_v50   ;;  %646 = vst [vmem:[%s176_s17 + $0x38] sm:$0xff] %v638_v51  }
 0x158   : > { %641 = vst [vmem:[%s176_s17 + $0x10] sm:$0xff] %v613_v54   ;;  %645 = vst [vmem:[%s176_s17 + $0x30] sm:$0xff] %v633_v55  }
 0x159   : > { %853 = shalt.err (!%p850_p7)
}
 0x15a   : > { %s854_s24 = scalar_lea.hbm %s1112_s4, 1024  ;;  %s858_s26 = scalar_lea.hbm %s1158_s2, 2048 }
 0x15b   : > { %p855_p9 = scmp.ne.s32.totalorder %s1112_s4, %s854_s24  ;;  %p859_p5 = scmp.lt.u32.totalorder %s1112_s4, %s1158_s2 }
 0x15c   : > { %p860_p11 = scmp.lt.u32.totalorder %s858_s26, %s854_s24  ;;  %p862_p4 = scmp.lt.u32.totalorder %s854_s24, %s1112_s4 }
 0x15d   : > { %p856_p2 = pnand %p855_p9, %p1027_p12 }
 0x15e   : > { %p861_p1 = por %p860_p11, %p859_p5 }
 0x15f   : > { %p857_p0 = pneg %p856_p2 }
 0x160   : > { %p863_p6 = por %p862_p4, %p861_p1 }
 0x162   : > { %p864_p8 = pnand %p863_p6, %p857_p0 }
 0x164   : > { %867 = shalt.err (!%p864_p8)
}
 0x165   : > { %s919_s3 = smov 64   ;;  %s920_s15 = smov 4  }
 0x166   : > { %717 = dma.vmem_to_hbm [thread:$0]  (%p1027_p12), %s1107_s27, 1024, %s1112_s4, %s446_s13, %s919_s3, %s919_s3, %s920_s15  }
 0x167 PF: > { %s474_s17 = sand.u32 1, %s898_s9   ;;  %p1173_p10 = scmp.ne.s32.totalorder %s1163_s16, 0 }
 0x168   : > { %p1174_p13 = scmp.ge.s32.totalorder %s910_s12, 2  ;;  %s475_s22 = scalar_lea.sflag [#allocation4], %s474_s17 }
 0x16a   : > { %p728_p3 = pnand %p1174_p13, %p1173_p10 }
 0x16c   : > { %893 = dma.done.wait (!%p728_p3), %s475_s22, 1024  }
 0x16d   : > { %895 = vsyncadd (!%p728_p3), %s475_s22, 4294966272  ;;  %p16_p7 = scmp.ge.s32.totalorder %s992_s21, 4   ;;  %s1175_s9 = smov %s902_s10 }
 0x16e   : > { %s1176_s10 = smov %s906_s11  ;;  %s1177_s11 = smov %s1023_s8 }
 0x16f   : > { %s1178_s12 = smov %s992_s21  ;;  %18 = sbr.rel (!%p16_p7) target bundleno = 6 (0x6), region = 77 }
 0x176   :  { %480 = vsyncpa [#allocation3], 1 }
 0x177   :  { %482 = vsyncpa [#allocation3 + $0x1], 1 }
 0x178   :  { %483 = vsyncpa [#allocation6], 1 }
 0x179   :  { %484 = vsyncpa [#allocation4], 1 }
 0x17a   :  { %486 = vsyncpa [#allocation4 + $0x1], 1 }

</bundles_post_ra>
